<compile_context>
chip_gen: v7x
topology: tpu7x:2x2x1
jax: 0.10.0
libtpu: 0.0.40
codegen_flags: <defaults>
</compile_context>

<pallas_src>
import functools

import jax
import jax.numpy as jnp
from jax.experimental import pallas as pl
from jax.experimental.pallas import tpu as pltpu


# ----------------------------- Pallas kernel -------------------------------


def _mlp_kernel(x_ref, w1_ref, b1_ref, w2_ref, b2_ref, o_ref, *, classify_eval):
    # x_ref : (TB, D_IN)        f32 batch tile
    # w1_ref: (D_IN, H)         bf16 (resident, constant index_map)
    # b1_ref: (1, H)            f32
    # w2_ref: (H, D_OUT_PAD)    bf16 (zero-padded to lane-dense width)
    # b2_ref: (1, D_OUT_PAD)    f32
    # o_ref : (TB, D_OUT_PAD)   f32
    x = x_ref[...].astype(jnp.bfloat16)
    h = jnp.dot(x, w1_ref[...], preferred_element_type=jnp.float32)
    h = jnp.maximum(h + b1_ref[...], 0.0)  # bias + ReLU in f32
    logits = jnp.dot(h.astype(jnp.bfloat16), w2_ref[...],
                     preferred_element_type=jnp.float32) + b2_ref[...]
    if classify_eval:
        # eval-mode classify path: (logits > 0.5).float()  (threshold kept in f32)
        logits = jnp.where(logits > 0.5, 1.0, 0.0)
    o_ref[...] = logits.astype(o_ref.dtype)


# ------------------------------- wrapper ------------------------------------


def _round_up(x, m):
    return ((x + m - 1) // m) * m


def _choose_tile_b(B, d_in, d_out_pad, max_tile=256):
    """Largest batch tile (<=256 rows, multiple of 8), preferring >=2 grid steps."""
    if B <= 8:
        return 8
    tile = min(max_tile, _round_up(-(-B // 2), 8))  # aim for >= 2 even-ish steps
    # keep double-buffered activation tiles comfortably inside VMEM
    while tile > 8 and 2 * tile * (d_in + d_out_pad) * 4 > (8 << 20):
        tile = max(8, _round_up(tile // 2, 8))
    return tile


def network_forward(x, params, *, task="reg", training=True, tile_b=None):
    """Pallas-fused forward pass of the generated Sequential network."""
    w1, b1, w2, b2 = params
    B, d_in = x.shape
    hdim = w1.shape[1]
    d_out = w2.shape[1]

    # ---- lane-dense output: pad D_OUT to a multiple of 128 (zero columns) ----
    d_out_pad = max(128, _round_up(d_out, 128))
    if d_out_pad != d_out:
        w2 = jnp.pad(w2, ((0, 0), (0, d_out_pad - d_out)))
        b2 = jnp.pad(b2, ((0, 0), (0, d_out_pad - d_out)))

    # ---- bf16 weights (MXU-native, half the DMA bytes); biases stay f32 ------
    w1 = w1.astype(jnp.bfloat16)
    w2 = w2.astype(jnp.bfloat16)
    b1 = b1.astype(jnp.float32)
    b2 = b2.astype(jnp.float32)

    # ---- batch tiling --------------------------------------------------------
    if tile_b is None:
        tile_b = _choose_tile_b(B, d_in, d_out_pad)
    b_pad = _round_up(B, tile_b)
    if b_pad != B:
        x = jnp.pad(x, ((0, b_pad - B), (0, 0)))
    grid = (b_pad // tile_b,)

    # ---- explicit VMEM budget (2x buffers for tiles + resident weights) ------
    weight_bytes = (d_in * hdim + hdim * d_out_pad) * 2 + (hdim + d_out_pad) * 4
    act_bytes = tile_b * (d_in + d_out_pad) * 4
    vmem_limit = min(max(4 * (2 * weight_bytes + 2 * act_bytes), 4 << 20), 32 << 20)

    classify_eval = (task == "classify") and (not training)
    kernel = functools.partial(_mlp_kernel, classify_eval=classify_eval)

    out = pl.pallas_call(
        kernel,
        out_shape=jax.ShapeDtypeStruct((b_pad, d_out_pad), jnp.float32),
        grid_spec=pltpu.PrefetchScalarGridSpec(
            num_scalar_prefetch=0,
            grid=grid,
            in_specs=[
                pl.BlockSpec((tile_b, d_in), lambda i: (i, 0)),     # x tile
                pl.BlockSpec((d_in, hdim), lambda i: (0, 0)),       # w1 (resident)
                pl.BlockSpec((1, hdim), lambda i: (0, 0)),          # b1
                pl.BlockSpec((hdim, d_out_pad), lambda i: (0, 0)),  # w2 (resident)
                pl.BlockSpec((1, d_out_pad), lambda i: (0, 0)),     # b2
            ],
            out_specs=pl.BlockSpec((tile_b, d_out_pad), lambda i: (i, 0)),
        ),
        compiler_params=pltpu.CompilerParams(
            dimension_semantics=("parallel",),
            vmem_limit_bytes=vmem_limit,
        ),
    )(x, w1, b1, w2, b2)

    return out[:B, :d_out]


# --------------------------- parameter generation ---------------------------


def init_params(key, d_in, hidden, d_out, dtype=jnp.float32):
    """Deterministic init mimicking PyTorch nn.Linear default (U[-1/sqrt(fan_in), ...])."""
    k1, k2, k3, k4 = jax.random.split(key, 4)
    lim1 = 1.0 / jnp.sqrt(jnp.asarray(d_in, jnp.float32))
    lim2 = 1.0 / jnp.sqrt(jnp.asarray(hidden, jnp.float32))
    w1 = jax.random.uniform(k1, (d_in, hidden), dtype, -lim1, lim1)
    b1 = jax.random.uniform(k2, (1, hidden), dtype, -lim1, lim1)
    w2 = jax.random.uniform(k3, (hidden, d_out), dtype, -lim2, lim2)
    b2 = jax.random.uniform(k4, (1, d_out), dtype, -lim2, lim2)
    return w1, b1, w2, b2


def reference_forward(x, params, *, task="reg", training=True):
    """Pure-JAX reference with the same bf16-matmul / f32-accumulate math."""
    w1, b1, w2, b2 = params
    h = jnp.dot(x.astype(jnp.bfloat16), w1.astype(jnp.bfloat16),
                preferred_element_type=jnp.float32)
    h = jnp.maximum(h + b1.astype(jnp.float32), 0.0)
    logits = jnp.dot(h.astype(jnp.bfloat16), w2.astype(jnp.bfloat16),
                     preferred_element_type=jnp.float32) + b2.astype(jnp.float32)
    if task == "classify" and not training:
        return (logits > 0.5).astype(jnp.float32)
    return logits


# ---------------------------------- main ------------------------------------

if __name__ == "__main__":
    # Small shapes consistent with the generated Sequential MLP.
    B, D_IN, HIDDEN, D_OUT = 256, 32, 128, 8

    key = jax.random.PRNGKey(0)
    kx, kp = jax.random.split(key)
    x = jax.random.normal(kx, (B, D_IN), jnp.float32)
    params = init_params(kp, D_IN, HIDDEN, D_OUT)

    # task='reg' forward (returns raw logits); tile chosen automatically (grid=(2,))
    out_reg = jax.block_until_ready(network_forward(x, params, task="reg", training=True))

    # task='classify', eval mode: (logits > 0.5).float()
    out_cls = jax.block_until_ready(
        network_forward(x, params, task="classify", training=False))

    # ragged batch (exercises the zero-pad / slice path)
    x_small = x[:20]
    out_small = jax.block_until_ready(
        network_forward(x_small, params, task="reg", training=True))

    # correctness checks against pure-JAX reference (same bf16/f32 math)
    ref_reg = reference_forward(x, params, task="reg", training=True)
    ref_cls = reference_forward(x, params, task="classify", training=False)
    ref_small = reference_forward(x_small, params, task="reg", training=True)
    assert out_reg.shape == (B, D_OUT) and out_cls.shape == (B, D_OUT)
    assert jnp.allclose(out_reg, ref_reg, atol=2e-3, rtol=2e-3)
    # classify: must agree with the reference everywhere except logits that sit
    # exactly on the 0.5 boundary (where a 1-ulp difference could flip the bit),
    # and must be self-consistent with thresholding the kernel's own logits.
    borderline = jnp.abs(ref_reg - 0.5) < 1e-3
    assert bool(jnp.all((out_cls == ref_cls) | borderline))
    assert bool(jnp.array_equal(out_cls, (out_reg > 0.5).astype(jnp.float32)))
    assert jnp.allclose(out_small, ref_small, atol=2e-3, rtol=2e-3)

    # TODO(synk): autoencoder task (decode(encode(X))) and Optimizer/back_propagate
    # are training/infra plumbing outside the forward hot path; not kernelized.

    print("KERNEL_OK")
</pallas_src>

<mosaic_0001>
module attributes {stable_mosaic.version = 11 : i64} {
  func.func @_mlp_kernel(%arg0: i32, %arg1: memref<128x32xf32, #tpu.memory_space<vmem>>, %arg2: memref<32x128xbf16, #tpu.memory_space<vmem>>, %arg3: memref<1x128xf32, #tpu.memory_space<vmem>>, %arg4: memref<128x128xbf16, #tpu.memory_space<vmem>>, %arg5: memref<1x128xf32, #tpu.memory_space<vmem>>, %arg6: memref<128x128xf32, #tpu.memory_space<vmem>>) attributes {dimension_semantics = [#tpu.dimension_semantics<parallel>], iteration_bounds = array<i64: 2>, scalar_prefetch = 0 : i64, scratch_operands = 0 : i64, tpu.core_type = #tpu.core_type<tc>, window_params = [{transform_indices = @transform_0, window_bounds = array<i64: 128, 32>}, {pipeline_mode = #tpu.pipeline_mode<synchronous>, transform_indices = @transform_1, window_bounds = array<i64: 32, 128>}, {pipeline_mode = #tpu.pipeline_mode<synchronous>, transform_indices = @transform_2, window_bounds = array<i64: 1, 128>}, {pipeline_mode = #tpu.pipeline_mode<synchronous>, transform_indices = @transform_3, window_bounds = array<i64: 128, 128>}, {pipeline_mode = #tpu.pipeline_mode<synchronous>, transform_indices = @transform_4, window_bounds = array<i64: 1, 128>}, {transform_indices = @transform_5, window_bounds = array<i64: 128, 128>}]} {
    %c0 = arith.constant 0 : index
    %c0_0 = arith.constant 0 : index
    %0 = vector.load %arg1[%c0, %c0_0] : memref<128x32xf32, #tpu.memory_space<vmem>>, vector<128x32xf32>
    %1 = arith.truncf %0 : vector<128x32xf32> to vector<128x32xbf16>
    %c0_1 = arith.constant 0 : index
    %c0_2 = arith.constant 0 : index
    %2 = vector.load %arg2[%c0_1, %c0_2] : memref<32x128xbf16, #tpu.memory_space<vmem>>, vector<32x128xbf16>
    %cst = arith.constant dense<0.000000e+00> : vector<128x128xf32>
    %3 = tpu.matmul %1, %2, %cst {dimension_numbers = #tpu.dot_dimension_numbers<[1], [0], [0], [1], [0, 0, 1, 1], [], []>} : vector<128x32xbf16>, vector<32x128xbf16>, vector<128x128xf32> -> vector<128x128xf32>
    %c0_3 = arith.constant 0 : index
    %c0_4 = arith.constant 0 : index
    %4 = vector.load %arg3[%c0_3, %c0_4] : memref<1x128xf32, #tpu.memory_space<vmem>>, vector<1x128xf32>
    %5 = vector.broadcast %4 : vector<1x128xf32> to vector<128x128xf32>
    %6 = arith.addf %3, %5 : vector<128x128xf32>
    %cst_5 = arith.constant 0.000000e+00 : f32
    %7 = vector.broadcast %cst_5 : f32 to vector<128x128xf32>
    %8 = arith.maximumf %6, %7 : vector<128x128xf32>
    %9 = arith.truncf %8 : vector<128x128xf32> to vector<128x128xbf16>
    %c0_6 = arith.constant 0 : index
    %c0_7 = arith.constant 0 : index
    %10 = vector.load %arg4[%c0_6, %c0_7] : memref<128x128xbf16, #tpu.memory_space<vmem>>, vector<128x128xbf16>
    %cst_8 = arith.constant dense<0.000000e+00> : vector<128x128xf32>
    %11 = tpu.matmul %9, %10, %cst_8 {dimension_numbers = #tpu.dot_dimension_numbers<[1], [0], [0], [1], [0, 0, 1, 1], [], []>} : vector<128x128xbf16>, vector<128x128xbf16>, vector<128x128xf32> -> vector<128x128xf32>
    %c0_9 = arith.constant 0 : index
    %c0_10 = arith.constant 0 : index
    %12 = vector.load %arg5[%c0_9, %c0_10] : memref<1x128xf32, #tpu.memory_space<vmem>>, vector<1x128xf32>
    %13 = vector.broadcast %12 : vector<1x128xf32> to vector<128x128xf32>
    %14 = arith.addf %11, %13 : vector<128x128xf32>
    %c0_11 = arith.constant 0 : index
    %c0_12 = arith.constant 0 : index
    %15 = vector.load %arg6[%c0_11, %c0_12] : memref<128x128xf32, #tpu.memory_space<vmem>>, vector<128x128xf32>
    tpu.vector_store %arg6[%c0_11, %c0_12], %14 {strides = array<i32>} : memref<128x128xf32, #tpu.memory_space<vmem>>, vector<128x128xf32>,
    return
  }
  func.func @transform_0(%arg0: i32) -> (i32, i32) {
    %c0_i32 = arith.constant 0 : i32
    %c0_i32_0 = arith.constant 0 : i32
    return %arg0, %c0_i32 : i32, i32
  }
  func.func @transform_1(%arg0: i32) -> (i32, i32) {
    %c0_i32 = arith.constant 0 : i32
    %c0_i32_0 = arith.constant 0 : i32
    %c0_i32_1 = arith.constant 0 : i32
    return %c0_i32, %c0_i32_0 : i32, i32
  }
  func.func @transform_2(%arg0: i32) -> (i32, i32) {
    %c0_i32 = arith.constant 0 : i32
    %c0_i32_0 = arith.constant 0 : i32
    %c0_i32_1 = arith.constant 0 : i32
    return %c0_i32, %c0_i32_0 : i32, i32
  }
  func.func @transform_3(%arg0: i32) -> (i32, i32) {
    %c0_i32 = arith.constant 0 : i32
    %c0_i32_0 = arith.constant 0 : i32
    %c0_i32_1 = arith.constant 0 : i32
    return %c0_i32, %c0_i32_0 : i32, i32
  }
  func.func @transform_4(%arg0: i32) -> (i32, i32) {
    %c0_i32 = arith.constant 0 : i32
    %c0_i32_0 = arith.constant 0 : i32
    %c0_i32_1 = arith.constant 0 : i32
    return %c0_i32, %c0_i32_0 : i32, i32
  }
  func.func @transform_5(%arg0: i32) -> (i32, i32) {
    %c0_i32 = arith.constant 0 : i32
    %c0_i32_0 = arith.constant 0 : i32
    return %arg0, %c0_i32 : i32, i32
  }
}

</mosaic_0001>

<bundles_post_ra>
// kernel: tpu_custom_call.1
= control target key start
LH: loop header
LB: loop body
LE: loop exit
PB: predicated region body
PF: predicated region fallthrough
CT: control target
= control target key end

     0   :  { %10 = vsyncpa [#allocation3], 0  ;;  %s1142_s0 = inlined_call_operand.vmem [shape: f32[256,32], index: 0, kind: input, shape index: {}]   ;;  %s1143_s1 = inlined_call_operand.vmem [shape: bf16[32,128], index: 1, kind: input, shape index: {}]   ;;  %s1144_s2 = inlined_call_operand.vmem [shape: f32[1,128], index: 2, kind: input, shape index: {}]   ;;  %s1145_s3 = inlined_call_operand.vmem [shape: bf16[128,128], index: 3, kind: input, shape index: {}]   ;;  %s1146_s4 = inlined_call_operand.vmem [shape: f32[1,128], index: 4, kind: input, shape index: {}]   ;;  %s1147_s5 = inlined_call_operand.hbm [shape: f32[256,128], index: 5, kind: output, shape index: {}]  }
   0x1   :  { %12 = vsyncpa [#allocation3 + $0x1], 0  ;;  %s955_s18 = smov 0   ;;  %s957_s19 = smov 0  }
   0x2   :  { %s959_s20 = smov 0   ;;  %s961_s21 = smov 0  }
   0x3 LB: > { %s976_s22 = sadd.s32 4294967295, %s920_s21   ;;  %s680_s23 = sadd.s32 4294967294, %s920_s21   ;;  %s920_s21 = sphi %s961_s21, %s1153_s21   ;;  %s916_s20 = sphi %s959_s20, %s1152_s20   ;;  %s912_s19 = sphi %s957_s19, %s1151_s19   ;;  %s908_s18 = sphi %s955_s18, %s1150_s18  }
   0x4   : > { %s980_s24 = sadd.s32 1, %s920_s21   ;;  %s135_s25 = sadd.s32 1, %s916_s20 }
   0x5   : > { %s132_s26 = ssub.s32 %s920_s21, %s980_s24  ;;  %p145_p0 = scmp.ne.s32.totalorder %s916_s20, %s912_s19 }
   0x6   : > { %p133_p1 = scmp.eq.s32.totalorder %s132_s26, 0  ;;  %p146_p2 = scmp.eq.s32.totalorder %s976_s22, 1 }
   0x7   : > { %p151_p3 = scmp.ne.s32.totalorder %s912_s19, %s908_s18  ;;  %p152_p4 = scmp.eq.s32.totalorder %s680_s23, 1 }
   0x8   : > { %s991_s27 = scalar_select %p133_p1, %s916_s20, %s135_s25  }
   0x9   : > { %p993_p5 = por %p146_p2, %p145_p0  ;;  %p997_p6 = por %p152_p4, %p151_p3 }
   0xa   : > { %p683_p7 = scmp.ge.s32.totalorder %s920_s21, 1  ;;  %p191_p8 = scmp.lt.s32.totalorder %s920_s21, 3 }
   0xc   : > { %p192_p9 = pnand %p683_p7, %p191_p8 }
   0xd   : > { %v848_v0 = vld [vmem:[%s1143_s1] sm:$0xff] (!%p192_p9)   ;;  %s685_s7 = sshll.u32 (!%p192_p9), %s976_s22, 4  ;;  %v849_v1 = vld [vmem:[%s1143_s1 + $0x8] sm:$0xff] (!%p192_p9)   ;;  %v852_v4 = vld [vmem:[%s1145_s3 + $0x10] sm:$0xff] (!%p192_p9)   ;;  %vm274_vm0 = vcmask (!%p192_p9), 261120   ;;  %s216_s16 = sand.u32 (!%p192_p9), 1, %s912_s19  }
   0xe   : > { %195 = sbr.rel (%p192_p9) target bundleno = 506 (0x1fa), region = 40  ;;  %p220_p10 = scmp.lt.s32.totalorder (!%p192_p9), %s685_s7, 31  ;;  %739 = vmatprep.subr.bf16.mxu0 (!%p192_p9), %v848_v0  ;;  %v850_v2 = vld [vmem:[%s1145_s3] sm:$0xff] (!%p192_p9)   ;;  %v851_v3 = vld [vmem:[%s1145_s3 + $0x8] sm:$0xff] (!%p192_p9)   ;;  %v853_v16 = vld [vmem:[%s1145_s3 + $0x18] sm:$0xff] (!%p192_p9)  }
   0xf   : > { %740 = vmatpush3.bf16.msra.mxu0 (!%p192_p9), %v848_v0  ;;  %791 = vmatprep.subr.bf16.mxu1 (!%p192_p9), %v850_v2  ;;  %v854_v21 = vld [vmem:[%s1145_s3 + $0x20] sm:$0xff] (!%p192_p9)   ;;  %v855_v24 = vld [vmem:[%s1145_s3 + $0x28] sm:$0xff] (!%p192_p9)   ;;  %v856_v32 = vld [vmem:[%s1145_s3 + $0x30] sm:$0xff] (!%p192_p9)   ;;  %s712_s30 = sshll.u32 (!%p192_p9), %s976_s22, 11  ;;  %s1101_s22 = scalar_lea.sflag (!%p192_p9), [#allocation3], %s216_s16 }
  0x10   : > { %741 = vmatprep.subr.bf16.mxu0 (!%p192_p9), %v849_v1  ;;  %799 = vmatpush3.bf16.msra.mxu1 (!%p192_p9), %v850_v2  ;;  %v857_v33 = vld [vmem:[%s1145_s3 + $0x38] sm:$0xff] (!%p192_p9)   ;;  %v687_v34 = vld [vmem:[%s1144_s2] ss:$0 sm:$0xff] (!%p192_p9)  ;;  %s1092_s9 = scalar_lea.hbm (!%p192_p9), %s1147_s5, %s712_s30  ;;  %s922_s11 = smov (!%p192_p9), [#allocation2]  }
  0x11   : > { %792 = vmatprep.subr.bf16.mxu1 (!%p192_p9), %v851_v3  ;;  %s862_s12 = sshll.u32 (!%p192_p9), %s922_s11, 4  ;;  %s863_s12 = int_to_ptr.vmem [resolvable:$false] %s862_s12 }
  0x12   : > { %s864_s13 = scalar_lea.vmem (!%p192_p9), %s863_s12, 4096 }
  0x13   : > { %742 = vmatpush3.bf16.msra.mxu0 (!%p192_p9), %v849_v1 }
  0x14   : > { %759 = vmatprep.subr.bf16.mxu0 (!%p192_p9), %v850_v2  ;;  %800 = vmatpush3.bf16.msra.mxu1 (!%p192_p9), %v851_v3 }
  0x15   : > { %s1155_s7 = smov (!%p220_p10, %s685_s7), 31  ;;  %793 = vmatprep.subr.bf16.mxu1 %v852_v4 }
  0x16   : > { %s686_s14 = sshll.u32 %s1155_s7, 3 }
  0x17   : > { %s1019_s17 = scalar_lea.vmem %s1142_s0, %s686_s14 }
  0x18   : > { %v227_v5 = vld [vmem:[%s1019_s17] sm:$0xff]  ;;  %v228_v6 = vld [vmem:[%s1019_s17 + $0x8] sm:$0xff]  ;;  %v229_v7 = vld [vmem:[%s1019_s17 + $0x10] sm:$0xff]  ;;  %801 = vmatpush3.bf16.msra.mxu1 %v852_v4 }
  0x19   : > { %v243_v8 = vpack.c.bf16 %v228_v6, %v227_v5  ;;  %v230_v9 = vld [vmem:[%s1019_s17 + $0x18] sm:$0xff]  ;;  %v231_v10 = vld [vmem:[%s1019_s17 + $0x20] sm:$0xff]  ;;  %v232_v11 = vld [vmem:[%s1019_s17 + $0x28] sm:$0xff]  ;;  %794 = vmatprep.subr.bf16.mxu1 %v853_v16 }
  0x1a   : > { %v244_v12 = vpack.c.bf16 %v230_v9, %v229_v7  ;;  %v245_v13 = vpack.c.bf16 %v232_v11, %v231_v10  ;;  %v233_v14 = vld [vmem:[%s1019_s17 + $0x30] sm:$0xff]  ;;  %v234_v15 = vld [vmem:[%s1019_s17 + $0x38] sm:$0xff]  ;;  %v235_v17 = vld [vmem:[%s1019_s17 + $0x40] sm:$0xff] }
  0x1b   : > { %743 = vmatprep.mubr.msk.bf16.mxu0 %vm274_vm0, %v243_v8  ;;  %v236_v18 = vld [vmem:[%s1019_s17 + $0x48] sm:$0xff]  ;;  %v246_v19 = vpack.c.bf16 %v234_v15, %v233_v14  ;;  %v237_v22 = vld [vmem:[%s1019_s17 + $0x50] sm:$0xff]  ;;  %v238_v23 = vld [vmem:[%s1019_s17 + $0x58] sm:$0xff] }
  0x1c   : > { %744 = vmatmul.mubr.msk.bf16.vlgmr.msra.gmra.mrb[0].mxu0 %vm274_vm0, %v244_v12  ;;  %v247_v20 = vpack.c.bf16 %v236_v18, %v235_v17  ;;  %802 = vmatpush3.bf16.msra.mxu1 %v853_v16  ;;  %v239_v25 = vld [vmem:[%s1019_s17 + $0x60] sm:$0xff]  ;;  %v240_v26 = vld [vmem:[%s1019_s17 + $0x68] sm:$0xff]  ;;  %v248_v27 = vpack.c.bf16 %v238_v23, %v237_v22  ;;  %v241_v29 = vld [vmem:[%s1019_s17 + $0x70] sm:$0xff] }
  0x1d   : > { %747 = vmatprep.mubr.msk.bf16.mxu0 %vm274_vm0, %v245_v13  ;;  %760 = vmatpush3.bf16.msra.mxu0 %v850_v2  ;;  %v249_v28 = vpack.c.bf16 %v240_v26, %v239_v25  ;;  %v242_v30 = vld [vmem:[%s1019_s17 + $0x78] sm:$0xff]  ;;  %s684_s17 = sshll.u32 %s216_s16, 7 }
  0x1e   : > { %761 = vmatprep.subr.bf16.mxu0 %v851_v3  ;;  %795 = vmatprep.subr.bf16.mxu1 %v854_v21  ;;  %v250_v31 = vpack.c.bf16 %v242_v30, %v241_v29  ;;  %s1072_s26 = scalar_lea.vmem [#allocation2], %s684_s17 }
  0x1f   : > { %s618_s6 = sshll.u32 %s1072_s26, 4  ;;  %s1094_s6 = int_to_ptr.vmem [resolvable:$true] %s618_s6 }
  0x20   : > { %803 = vmatpush3.bf16.msra.mxu1 %v854_v21  ;;  %s858_s10 = scalar_lea.vmem %s1094_s6, 2048  ;;  %p865_p0 = scmp.lt.s32.totalorder %s1094_s6, %s863_s12 }
  0x21   : > { %762 = vmatpush3.bf16.msra.mxu0 %v851_v3  ;;  %796 = vmatprep.subr.bf16.mxu1 %v855_v24  ;;  %p859_p11 = scmp.ne.s32.totalorder %s1094_s6, %s858_s10  ;;  %p866_p1 = scmp.lt.s32.totalorder %s864_s13, %s858_s10 }
  0x22   : > { %763 = vmatprep.subr.bf16.mxu0 %v852_v4 }
  0x23   : > { %p860_p12 = pnand %p859_p11, %p993_p5  ;;  %p867_p2 = por %p866_p1, %p865_p0 }
  0x24   : > { %748 = vmatmul.mubr.msk.bf16.gmra.mrb[4].mxu0 %vm274_vm0, %v246_v19  ;;  %804 = vmatpush3.bf16.msra.mxu1 %v855_v24 }
  0x25   : > { %751 = vmatprep.mubr.msk.bf16.mxu0 %vm274_vm0, %v247_v20  ;;  %764 = vmatpush3.bf16.msra.mxu0 %v852_v4  ;;  %p861_p13 = pneg %p860_p12 }
  0x26   : > { %765 = vmatprep.subr.bf16.mxu0 %v853_v16  ;;  %797 = vmatprep.subr.bf16.mxu1 %v856_v32 }
  0x27   : > { %p868_p3 = pnand %p867_p2, %p861_p13 }
  0x28   : > { %805 = vmatpush3.bf16.msra.mxu1 %v856_v32 }
  0x29   : > { %766 = vmatpush3.bf16.msra.mxu0 %v853_v16  ;;  %798 = vmatprep.subr.bf16.mxu1 %v857_v33 }
  0x2a   : > { %767 = vmatprep.subr.bf16.mxu0 %v854_v21 }
  0x2c   : > { %752 = vmatmul.mubr.msk.bf16.gmra.mrb[8].mxu0 %vm274_vm0, %v248_v27  ;;  %806 = vmatpush3.bf16.msra.mxu1 %v857_v33  ;;  %v698_v27 = vld [vmem:[%s1146_s4] ss:$0 sm:$0xff] }
  0x2d   : > { %755 = vmatprep.mubr.msk.bf16.mxu0 %vm274_vm0, %v249_v28  ;;  %768 = vmatpush3.bf16.msra.mxu0 %v854_v21 }
  0x2e   : > { %769 = vmatprep.subr.bf16.mxu0 %v855_v24 }
  0x31   : > { %770 = vmatpush3.bf16.msra.mxu0 %v855_v24 }
  0x32   : > { %771 = vmatprep.subr.bf16.mxu0 %v856_v32 }
  0x34   : > { %756 = vmatmul.mubr.msk.bf16.gmra.mrb[12].mxu0 %vm274_vm0, %v250_v31 }
  0x35   : > { %772 = vmatpush3.bf16.msra.mxu0 %v856_v32 }
  0x36   : > { %773 = vmatprep.subr.bf16.mxu0 %v857_v33 }
  0x39   : > { %774 = vmatpush3.bf16.msra.mxu0 %v857_v33 }
  0xef   : > { %v745_v35 = vpop.f32.mrb[0].mxu0 }
  0xf0   : > { %v342_v36 = vadd.f32 %v745_v35, %v687_v34  ;;  %v333_v37 = vpop.f32.mrb[1].mxu0 }
  0xf1   : > { %v334_v38 = vadd.f32 %v687_v34, %v333_v37  ;;  %v746_v39 = vpop.f32.mrb[2].mxu0 }
  0xf2   : > { %v345_v40 = vadd.f32 %v746_v39, %v687_v34  ;;  %v336_v41 = vpop.f32.mrb[3].mxu0  ;;  %v398_v43 = vmax.f32 %v342_v36, 0.0 }
  0xf3   : > { %v337_v42 = vadd.f32 %v687_v34, %v336_v41  ;;  %v396_v45 = vmax.f32 %v334_v38, 0.0 }
  0xf4   : > { %v399_v44 = vmax.f32 %v345_v40, 0.0 }
  0xf5   : > { %v397_v46 = vmax.f32 %v337_v42, 0.0 }
  0xf6   : > { %v413_v47 = vpack.c.bf16 %v399_v44, %v398_v43 }
  0xf7   : > { %v412_v48 = vpack.c.bf16 %v397_v46, %v396_v45  ;;  %v749_v49 = vpop.f32.mrb[4].mxu0 }
  0xf8   : > { %v358_v50 = vadd.f32 %v749_v49, %v687_v34  ;;  %v349_v51 = vpop.f32.mrb[5].mxu0 }
  0xf9   : > { %v350_v52 = vadd.f32 %v687_v34, %v349_v51  ;;  %v750_v53 = vpop.f32.mrb[6].mxu0  ;;  %775 = vmatprep.mubr.bf16.mxu0 %v412_v48 }
  0xfa   : > { %v361_v54 = vadd.f32 %v750_v53, %v687_v34  ;;  %v352_v55 = vpop.f32.mrb[7].mxu0  ;;  %776 = vmatmul.mubr.bf16.vlgmr.msra.gmra.mrb[16].mxu0 %v413_v47  ;;  %v402_v57 = vmax.f32 %v358_v50, 0.0 }
  0xfb   : > { %v353_v56 = vadd.f32 %v687_v34, %v352_v55  ;;  %v400_v59 = vmax.f32 %v350_v52, 0.0 }
  0xfc   : > { %v403_v58 = vmax.f32 %v361_v54, 0.0 }
  0xfd   : > { %v401_v60 = vmax.f32 %v353_v56, 0.0 }
  0xfe   : > { %v415_v61 = vpack.c.bf16 %v403_v58, %v402_v57 }
  0xff   : > { %v753_v62 = vpop.f32.mrb[8].mxu0  ;;  %v414_v63 = vpack.c.bf16 %v401_v60, %v400_v59 }
 0x100   : > { %v374_v0 = vadd.f32 %v753_v62, %v687_v34  ;;  %v365_v1 = vpop.f32.mrb[9].mxu0 }
 0x101   : > { %v366_v2 = vadd.f32 %v687_v34, %v365_v1  ;;  %v754_v3 = vpop.f32.mrb[10].mxu0  ;;  %779 = vmatprep.mubr.bf16.mxu1 %v414_v63 }
 0x102   : > { %v377_v4 = vadd.f32 %v754_v3, %v687_v34  ;;  %v368_v5 = vpop.f32.mrb[11].mxu0  ;;  %780 = vmatmul.mubr.bf16.vlgmr.msra.gmra.mrb[0].mxu1 %v415_v61  ;;  %v406_v7 = vmax.f32 %v374_v0, 0.0 }
 0x103   : > { %v369_v6 = vadd.f32 %v687_v34, %v368_v5  ;;  %v404_v9 = vmax.f32 %v366_v2, 0.0 }
 0x104   : > { %v407_v8 = vmax.f32 %v377_v4, 0.0 }
 0x105   : > { %v405_v10 = vmax.f32 %v369_v6, 0.0 }
 0x106   : > { %v417_v11 = vpack.c.bf16 %v407_v8, %v406_v7 }
 0x107   : > { %v416_v12 = vpack.c.bf16 %v405_v10, %v404_v9  ;;  %v757_v13 = vpop.f32.mrb[12].mxu0 }
 0x108   : > { %v390_v14 = vadd.f32 %v757_v13, %v687_v34  ;;  %v381_v15 = vpop.f32.mrb[13].mxu0 }
 0x109   : > { %v382_v16 = vadd.f32 %v687_v34, %v381_v15  ;;  %v758_v17 = vpop.f32.mrb[14].mxu0  ;;  %783 = vmatprep.mubr.bf16.mxu1 %v416_v12 }
 0x10a   : > { %v393_v18 = vadd.f32 %v758_v17, %v687_v34  ;;  %v384_v19 = vpop.f32.mrb[15].mxu0  ;;  %784 = vmatmul.mubr.bf16.gmra.mrb[4].mxu1 %v417_v11  ;;  %v410_v21 = vmax.f32 %v390_v14, 0.0 }
 0x10b   : > { %v385_v20 = vadd.f32 %v687_v34, %v384_v19  ;;  %v408_v23 = vmax.f32 %v382_v16, 0.0 }
 0x10c   : > { %v411_v22 = vmax.f32 %v393_v18, 0.0 }
 0x10d   : > { %v409_v24 = vmax.f32 %v385_v20, 0.0 }
 0x10e   : > { %v419_v25 = vpack.c.bf16 %v411_v22, %v410_v21 }
 0x10f   : > { %v418_v26 = vpack.c.bf16 %v409_v24, %v408_v23 }
 0x111   : > { %787 = vmatprep.mubr.bf16.mxu1 %v418_v26 }
 0x112   : > { %788 = vmatmul.mubr.bf16.gmra.mrb[8].mxu1 %v419_v25 }
 0x1cd   : > { %v777_v28 = vpop.f32.mrb[16].mxu0 }
 0x1ce   : > { %v534_v29 = vadd.f32 %v777_v28, %v698_v27  ;;  %v525_v30 = vpop.f32.mrb[17].mxu0 }
 0x1cf   : > { %v526_v31 = vadd.f32 %v698_v27, %v525_v30  ;;  %v778_v32 = vpop.f32.mrb[18].mxu0 }
 0x1d0   : > { %590 = vst [vmem:[%s1072_s26 + $0x10] sm:$0xff] %v534_v29  ;;  %v537_v33 = vadd.f32 %v778_v32, %v698_v27  ;;  %v528_v34 = vpop.f32.mrb[19].mxu0 }
 0x1d1   : > { %588 = vst [vmem:[%s1072_s26] sm:$0xff] %v526_v31  ;;  %v529_v35 = vadd.f32 %v698_v27, %v528_v34 }
 0x1d2   : > { %591 = vst [vmem:[%s1072_s26 + $0x18] sm:$0xff] %v537_v33 }
 0x1d3   : > { %589 = vst [vmem:[%s1072_s26 + $0x8] sm:$0xff] %v529_v35 }
 0x1d5   : > { %v781_v36 = vpop.f32.mrb[0].mxu1 }
 0x1d6   : > { %v550_v37 = vadd.f32 %v781_v36, %v698_v27  ;;  %v541_v38 = vpop.f32.mrb[1].mxu1 }
 0x1d7   : > { %v542_v39 = vadd.f32 %v698_v27, %v541_v38  ;;  %v782_v40 = vpop.f32.mrb[2].mxu1 }
 0x1d8   : > { %594 = vst [vmem:[%s1072_s26 + $0x30] sm:$0xff] %v550_v37  ;;  %v553_v41 = vadd.f32 %v782_v40, %v698_v27  ;;  %v544_v42 = vpop.f32.mrb[3].mxu1 }
 0x1d9   : > { %592 = vst [vmem:[%s1072_s26 + $0x20] sm:$0xff] %v542_v39  ;;  %v545_v43 = vadd.f32 %v698_v27, %v544_v42 }
 0x1da   : > { %595 = vst [vmem:[%s1072_s26 + $0x38] sm:$0xff] %v553_v41 }
 0x1db   : > { %593 = vst [vmem:[%s1072_s26 + $0x28] sm:$0xff] %v545_v43 }
 0x1dd   : > { %v785_v44 = vpop.f32.mrb[4].mxu1 }
 0x1de   : > { %v566_v45 = vadd.f32 %v785_v44, %v698_v27  ;;  %v557_v46 = vpop.f32.mrb[5].mxu1 }
 0x1df   : > { %v558_v47 = vadd.f32 %v698_v27, %v557_v46  ;;  %v786_v48 = vpop.f32.mrb[6].mxu1 }
 0x1e0   : > { %598 = vst [vmem:[%s1072_s26 + $0x50] sm:$0xff] %v566_v45  ;;  %v569_v49 = vadd.f32 %v786_v48, %v698_v27  ;;  %v560_v50 = vpop.f32.mrb[7].mxu1 }
 0x1e1   : > { %596 = vst [vmem:[%s1072_s26 + $0x40] sm:$0xff] %v558_v47  ;;  %v561_v51 = vadd.f32 %v698_v27, %v560_v50 }
 0x1e2   : > { %599 = vst [vmem:[%s1072_s26 + $0x58] sm:$0xff] %v569_v49 }
 0x1e3   : > { %597 = vst [vmem:[%s1072_s26 + $0x48] sm:$0xff] %v561_v51 }
 0x1e5   : > { %v789_v52 = vpop.f32.mrb[8].mxu1 }
 0x1e6   : > { %v582_v53 = vadd.f32 %v789_v52, %v698_v27  ;;  %v573_v54 = vpop.f32.mrb[9].mxu1 }
 0x1e7   : > { %v574_v55 = vadd.f32 %v698_v27, %v573_v54  ;;  %v790_v56 = vpop.f32.mrb[10].mxu1 }
 0x1e8   : > { %602 = vst [vmem:[%s1072_s26 + $0x70] sm:$0xff] %v582_v53  ;;  %v585_v57 = vadd.f32 %v790_v56, %v698_v27  ;;  %v576_v58 = vpop.f32.mrb[11].mxu1 }
 0x1e9   : > { %600 = vst [vmem:[%s1072_s26 + $0x60] sm:$0xff] %v574_v55  ;;  %v577_v59 = vadd.f32 %v698_v27, %v576_v58 }
 0x1ea   : > { %603 = vst [vmem:[%s1072_s26 + $0x78] sm:$0xff] %v585_v57 }
 0x1eb   : > { %601 = vst [vmem:[%s1072_s26 + $0x68] sm:$0xff] %v577_v59 }
 0x1ec   : > { %871 = shalt.err (!%p868_p3)
}
 0x1ed   : > { %s872_s14 = scalar_lea.hbm %s1092_s9, 2048  ;;  %s876_s17 = scalar_lea.hbm %s1147_s5, 4096 }
 0x1ee   : > { %p873_p4 = scmp.ne.s32.totalorder %s1092_s9, %s872_s14  ;;  %p877_p9 = scmp.lt.u32.totalorder %s1092_s9, %s1147_s5 }
 0x1ef   : > { %p878_p10 = scmp.lt.u32.totalorder %s876_s17, %s872_s14  ;;  %p880_p12 = scmp.lt.u32.totalorder %s872_s14, %s1092_s9 }
 0x1f0   : > { %p874_p7 = pnand %p873_p4, %p993_p5 }
 0x1f1   : > { %p879_p11 = por %p878_p10, %p877_p9 }
 0x1f2   : > { %p875_p8 = pneg %p874_p7 }
 0x1f3   : > { %p881_p13 = por %p880_p12, %p879_p11 }
 0x1f5   : > { %p882_p0 = pnand %p881_p13, %p875_p8 }
 0x1f7   : > { %885 = shalt.err (!%p882_p0)
}
 0x1f8   : > { %s923_s26 = smov 128   ;;  %s924_s30 = smov 8  }
 0x1f9   : > { %807 = dma.vmem_to_hbm [thread:$0]  (%p993_p5), %s1094_s6, 2048, %s1092_s9, %s1101_s22, %s923_s26, %s923_s26, %s924_s30  }
 0x1fa PF: > { %p813_p1 = scmp.ge.s32.totalorder %s920_s21, 2  ;;  %s633_s7 = sand.u32 1, %s908_s18  }
 0x1fb   : > { %s634_s8 = scalar_lea.sflag [#allocation3], %s633_s7 }
 0x1fc   : > { %p810_p2 = pnand %p813_p1, %p997_p6 }
 0x1fe   : > { %903 = dma.done.wait (!%p810_p2), %s634_s8, 2048  }
 0x1ff   : > { %905 = vsyncadd (!%p810_p2), %s634_s8, 4294965248  ;;  %p15_p3 = scmp.ge.s32.totalorder %s980_s24, 4   ;;  %s1150_s18 = smov %s912_s19 }
 0x200   : > { %s1151_s19 = smov %s916_s20  ;;  %s1152_s20 = smov %s991_s27 }
 0x201   : > { %s1153_s21 = smov %s980_s24  ;;  %17 = sbr.rel (!%p15_p3) target bundleno = 3 (0x3), region = 75 }
 0x208   :  { %639 = vsyncpa [#allocation3], 1 }
 0x209   :  { %641 = vsyncpa [#allocation3 + $0x1], 1 }

</bundles_post_ra>
